<compile_context>
chip_gen: v7x
topology: tpu7x:2x2x1
jax: 0.10.0
libtpu: 0.0.40
codegen_flags: <defaults>
</compile_context>

<pallas_src>
import functools

import jax
import jax.numpy as jnp
from jax.experimental import pallas as pl
from jax.experimental.pallas import tpu as pltpu


def _cam_kernel(x_ref, w1t_ref, b1_ref, w2t_ref, b2_ref, o_ref, *, hw):
    # x_ref / o_ref: (TB, C, HW) tile; weights pre-transposed to (in, out).
    x = x_ref[...]                                    # native dtype, no f32 copy
    tb = x.shape[0]

    # --- channel-wise global max / avg pooling over the (lane) spatial axis ---
    maxv = jnp.max(x, axis=-1)                                          # (TB, C)
    avgv = jnp.sum(x, axis=-1, dtype=jnp.float32) * (1.0 / float(hw))   # (TB, C)

    # --- shared MLP: both pooled vectors in one stacked matmul pair (MXU) -----
    p = jnp.concatenate([maxv.astype(jnp.float32), avgv], axis=0)       # (2*TB, C)
    w1t = w1t_ref[...].astype(jnp.float32)                              # (C, Cr)
    b1 = b1_ref[...].astype(jnp.float32)                                # (1, Cr)
    w2t = w2t_ref[...].astype(jnp.float32)                              # (Cr, C)
    b2 = b2_ref[...].astype(jnp.float32)                                # (1, C)

    h = jnp.maximum(jnp.dot(p, w1t, preferred_element_type=jnp.float32) + b1, 0.0)
    y = jnp.dot(h, w2t, preferred_element_type=jnp.float32) + b2        # (2*TB, C)
    gate = jax.nn.sigmoid(y[:tb] + y[tb:])                              # (TB, C)

    # --- broadcast channel gate over spatial positions, in the input dtype ----
    o_ref[...] = x * gate.astype(x.dtype)[:, :, None]


def _round_up(v, m):
    return ((v + m - 1) // m) * m


def cam_forward(x, w1, b1, w2, b2, *, block_batch=None):
    """CBAM channel-attention forward.

    x : (B, C, H, W) NCHW
    w1: (C//r, C), b1: (C//r,)  -- first torch Linear (out, in) layout
    w2: (C, C//r), b2: (C,)     -- second torch Linear
    """
    B, C, H, W = x.shape
    Cr = w1.shape[0]
    HW = H * W
    itemsize = jnp.dtype(x.dtype).itemsize

    # Flatten spatial (free reshape, contiguous dims). No padding: the block
    # covers the full trailing dims, Mosaic masks the partial last vreg.
    xf = x.reshape(B, C, HW)

    # Per-batch-element VMEM footprint after (sublane, lane) layout padding.
    sub_mult = max(8, 32 // itemsize)            # f32: 8, bf16: 16, int8: 32
    per_batch_vmem = _round_up(C, sub_mult) * _round_up(HW, 128) * itemsize

    # Pick batch tile: largest divisor of B keeping 4 live x-blocks
    # (double-buffered in + out) under ~28 MiB and, when B >= 2, leaving at
    # least 2 grid steps so both v7x TensorCores get work.
    if block_batch is None:
        cap = max(1, (28 << 20) // (4 * per_batch_vmem))
        block_batch = 1
        for tb in range(1, B + 1):
            if B % tb or tb > cap:
                continue
            if B >= 2 and B // tb < 2:
                continue
            block_batch = tb
    TB = block_batch
    grid = (B // TB,)

    # VMEM limit: actual block footprint + margin, floor 32 MiB
    # (> v5e's 16 MiB scoped default, <= v7x's 64 MiB physical for sane sizes).
    needed = 4 * TB * per_batch_vmem + (2 << 20)
    vmem_limit = max(32 << 20, needed)

    # Pre-transpose weights to (in, out) so the kernel does no transposes.
    w1t = w1.T                                    # (C, Cr)
    w2t = w2.T                                    # (Cr, C)
    b1r = b1.reshape(1, Cr)
    b2r = b2.reshape(1, C)

    kernel = functools.partial(_cam_kernel, hw=HW)

    out = pl.pallas_call(
        kernel,
        out_shape=jax.ShapeDtypeStruct((B, C, HW), x.dtype),
        grid_spec=pltpu.PrefetchScalarGridSpec(
            num_scalar_prefetch=0,
            grid=grid,
            in_specs=[
                pl.BlockSpec((TB, C, HW), lambda b: (b, 0, 0)),
                # Grid-invariant (constant index_map) weights/biases: Pallas
                # skips the re-fetch between steps; they are tiny vs the x block.
                pl.BlockSpec((C, Cr), lambda b: (0, 0)),
                pl.BlockSpec((1, Cr), lambda b: (0, 0)),
                pl.BlockSpec((Cr, C), lambda b: (0, 0)),
                pl.BlockSpec((1, C), lambda b: (0, 0)),
            ],
            out_specs=pl.BlockSpec((TB, C, HW), lambda b: (b, 0, 0)),
        ),
        compiler_params=pltpu.CompilerParams(
            dimension_semantics=("parallel",),
            vmem_limit_bytes=int(vmem_limit),
        ),
    )(xf, w1t, b1r, w2t, b2r)

    return out.reshape(B, C, H, W)


def cam_reference(x, w1, b1, w2, b2):
    """Pure-JAX reference mirroring the PyTorch forward."""
    B, C, H, W = x.shape
    maxp = jnp.max(x.reshape(B, C, -1), axis=-1)     # (B, C)
    avgp = jnp.mean(x.reshape(B, C, -1), axis=-1)    # (B, C)

    def mlp(p):  # p: (B, C); torch Linear: y = p @ W.T + b
        h = jnp.maximum(p @ w1.T + b1, 0.0)
        return h @ w2.T + b2

    gate = jax.nn.sigmoid(mlp(maxp) + mlp(avgp))     # (B, C)
    return gate[:, :, None, None] * x


if __name__ == "__main__":
    key = jax.random.PRNGKey(0)

    # Case 1: spatial already a multiple of 128 lanes (lane-dense path).
    B, C, H, W, r = 2, 4, 16, 16, 2
    Cr = C // r
    k_x, k_w1, k_b1, k_w2, k_b2 = jax.random.split(key, 5)
    x = jax.random.normal(k_x, (B, C, H, W), dtype=jnp.float32)
    w1 = jax.random.normal(k_w1, (Cr, C), dtype=jnp.float32) * 0.1
    b1 = jax.random.normal(k_b1, (Cr,), dtype=jnp.float32) * 0.1
    w2 = jax.random.normal(k_w2, (C, Cr), dtype=jnp.float32) * 0.1
    b2 = jax.random.normal(k_b2, (C,), dtype=jnp.float32) * 0.1

    out = jax.block_until_ready(cam_forward(x, w1, b1, w2, b2))
    ref = cam_reference(x, w1, b1, w2, b2)
    assert out.shape == (B, C, H, W)
    assert jnp.allclose(out, ref, atol=1e-5, rtol=1e-5), "mismatch vs reference (case 1)"

    # Case 2: HW=49 exercises the non-128-multiple (masked partial vreg) path.
    B2, C2, H2, W2, r2 = 2, 8, 7, 7, 4
    Cr2 = C2 // r2
    k_x2, k_w12, k_b12, k_w22, k_b22 = jax.random.split(jax.random.PRNGKey(1), 5)
    x2 = jax.random.normal(k_x2, (B2, C2, H2, W2), dtype=jnp.float32)
    w12 = jax.random.normal(k_w12, (Cr2, C2), dtype=jnp.float32) * 0.1
    b12 = jax.random.normal(k_b12, (Cr2,), dtype=jnp.float32) * 0.1
    w22 = jax.random.normal(k_w22, (C2, Cr2), dtype=jnp.float32) * 0.1
    b22 = jax.random.normal(k_b22, (C2,), dtype=jnp.float32) * 0.1

    out2 = jax.block_until_ready(cam_forward(x2, w12, b12, w22, b22))
    ref2 = cam_reference(x2, w12, b12, w22, b22)
    assert out2.shape == (B2, C2, H2, W2)
    assert jnp.allclose(out2, ref2, atol=1e-5, rtol=1e-5), "mismatch vs reference (case 2)"

    print("KERNEL_OK")
</pallas_src>

<mosaic_0001>
module attributes {stable_mosaic.version = 11 : i64} {
  func.func @_cam_kernel(%arg0: i32, %arg1: memref<1x4x256xf32, #tpu.memory_space<vmem>>, %arg2: memref<4x2xf32, #tpu.memory_space<vmem>>, %arg3: memref<1x2xf32, #tpu.memory_space<vmem>>, %arg4: memref<2x4xf32, #tpu.memory_space<vmem>>, %arg5: memref<1x4xf32, #tpu.memory_space<vmem>>, %arg6: memref<1x4x256xf32, #tpu.memory_space<vmem>>) attributes {dimension_semantics = [#tpu.dimension_semantics<parallel>], iteration_bounds = array<i64: 2>, scalar_prefetch = 0 : i64, scratch_operands = 0 : i64, tpu.core_type = #tpu.core_type<tc>, window_params = [{transform_indices = @transform_0, window_bounds = array<i64: 1, 4, 256>}, {pipeline_mode = #tpu.pipeline_mode<synchronous>, transform_indices = @transform_1, window_bounds = array<i64: 4, 2>}, {pipeline_mode = #tpu.pipeline_mode<synchronous>, transform_indices = @transform_2, window_bounds = array<i64: 1, 2>}, {pipeline_mode = #tpu.pipeline_mode<synchronous>, transform_indices = @transform_3, window_bounds = array<i64: 2, 4>}, {pipeline_mode = #tpu.pipeline_mode<synchronous>, transform_indices = @transform_4, window_bounds = array<i64: 1, 4>}, {transform_indices = @transform_5, window_bounds = array<i64: 1, 4, 256>}]} {
    %c0 = arith.constant 0 : index
    %c0_0 = arith.constant 0 : index
    %c0_1 = arith.constant 0 : index
    %0 = vector.load %arg1[%c0, %c0_0, %c0_1] : memref<1x4x256xf32, #tpu.memory_space<vmem>>, vector<1x4x256xf32>
    %cst = arith.constant dense<0xFF800000> : vector<1x4xf32>
    %1 = vector.multi_reduction <maximumf>, %0, %cst [2] : vector<1x4x256xf32> to vector<1x4xf32>
    %cst_2 = arith.constant dense<0.000000e+00> : vector<1x4xf32>
    %2 = vector.multi_reduction <add>, %0, %cst_2 [2] : vector<1x4x256xf32> to vector<1x4xf32>
    %cst_3 = arith.constant 3.906250e-03 : f32
    %3 = vector.broadcast %cst_3 : f32 to vector<1x4xf32>
    %4 = arith.mulf %2, %3 : vector<1x4xf32>
    %5 = tpu.concatenate %1, %4 in 0 : vector<1x4xf32>, vector<1x4xf32> -> vector<2x4xf32>
    %c0_4 = arith.constant 0 : index
    %c0_5 = arith.constant 0 : index
    %6 = vector.load %arg2[%c0_4, %c0_5] : memref<4x2xf32, #tpu.memory_space<vmem>>, vector<4x2xf32>
    %c0_6 = arith.constant 0 : index
    %c0_7 = arith.constant 0 : index
    %7 = vector.load %arg3[%c0_6, %c0_7] : memref<1x2xf32, #tpu.memory_space<vmem>>, vector<1x2xf32>
    %c0_8 = arith.constant 0 : index
    %c0_9 = arith.constant 0 : index
    %8 = vector.load %arg4[%c0_8, %c0_9] : memref<2x4xf32, #tpu.memory_space<vmem>>, vector<2x4xf32>
    %c0_10 = arith.constant 0 : index
    %c0_11 = arith.constant 0 : index
    %9 = vector.load %arg5[%c0_10, %c0_11] : memref<1x4xf32, #tpu.memory_space<vmem>>, vector<1x4xf32>
    %cst_12 = arith.constant dense<0.000000e+00> : vector<2x2xf32>
    %10 = tpu.matmul %5, %6, %cst_12 {dimension_numbers = #tpu.dot_dimension_numbers<[1], [0], [0], [1], [0, 0, 1, 1], [], []>} : vector<2x4xf32>, vector<4x2xf32>, vector<2x2xf32> -> vector<2x2xf32>
    %11 = vector.broadcast %7 : vector<1x2xf32> to vector<2x2xf32>
    %12 = arith.addf %10, %11 : vector<2x2xf32>
    %cst_13 = arith.constant 0.000000e+00 : f32
    %13 = vector.broadcast %cst_13 : f32 to vector<2x2xf32>
    %14 = arith.maximumf %12, %13 : vector<2x2xf32>
    %cst_14 = arith.constant dense<0.000000e+00> : vector<2x4xf32>
    %15 = tpu.matmul %14, %8, %cst_14 {dimension_numbers = #tpu.dot_dimension_numbers<[1], [0], [0], [1], [0, 0, 1, 1], [], []>} : vector<2x2xf32>, vector<2x4xf32>, vector<2x4xf32> -> vector<2x4xf32>
    %16 = vector.broadcast %9 : vector<1x4xf32> to vector<2x4xf32>
    %17 = arith.addf %15, %16 : vector<2x4xf32>
    %18 = vector.extract_strided_slice %17 {offsets = [0, 0], sizes = [1, 4], strides = [1, 1]} : vector<2x4xf32> to vector<1x4xf32>
    %19 = vector.extract_strided_slice %17 {offsets = [1, 0], sizes = [1, 4], strides = [1, 1]} : vector<2x4xf32> to vector<1x4xf32>
    %20 = arith.addf %18, %19 : vector<1x4xf32>
    %21 = arith.negf %20 : vector<1x4xf32>
    %22 = math.exp %21 : vector<1x4xf32>
    %cst_15 = arith.constant 1.000000e+00 : f32
    %23 = vector.broadcast %cst_15 : f32 to vector<1x4xf32>
    %24 = arith.addf %23, %22 : vector<1x4xf32>
    %25 = arith.divf %23, %24 : vector<1x4xf32>
    %26 = vector.shape_cast %25 : vector<1x4xf32> to vector<1x4x1xf32>
    %27 = vector.broadcast %26 : vector<1x4x1xf32> to vector<1x4x256xf32>
    %28 = arith.mulf %0, %27 : vector<1x4x256xf32>
    %c0_16 = arith.constant 0 : index
    %c0_17 = arith.constant 0 : index
    %c0_18 = arith.constant 0 : index
    %29 = vector.load %arg6[%c0_16, %c0_17, %c0_18] : memref<1x4x256xf32, #tpu.memory_space<vmem>>, vector<1x4x256xf32>
    tpu.vector_store %arg6[%c0_16, %c0_17, %c0_18], %28 {strides = array<i32>} : memref<1x4x256xf32, #tpu.memory_space<vmem>>, vector<1x4x256xf32>,
    return
  }
  func.func @transform_0(%arg0: i32) -> (i32, i32, i32) {
    %c0_i32 = arith.constant 0 : i32
    %c0_i32_0 = arith.constant 0 : i32
    %c0_i32_1 = arith.constant 0 : i32
    return %arg0, %c0_i32, %c0_i32_0 : i32, i32, i32
  }
  func.func @transform_1(%arg0: i32) -> (i32, i32) {
    %c0_i32 = arith.constant 0 : i32
    %c0_i32_0 = arith.constant 0 : i32
    %c0_i32_1 = arith.constant 0 : i32
    return %c0_i32, %c0_i32_0 : i32, i32
  }
  func.func @transform_2(%arg0: i32) -> (i32, i32) {
    %c0_i32 = arith.constant 0 : i32
    %c0_i32_0 = arith.constant 0 : i32
    %c0_i32_1 = arith.constant 0 : i32
    return %c0_i32, %c0_i32_0 : i32, i32
  }
  func.func @transform_3(%arg0: i32) -> (i32, i32) {
    %c0_i32 = arith.constant 0 : i32
    %c0_i32_0 = arith.constant 0 : i32
    %c0_i32_1 = arith.constant 0 : i32
    return %c0_i32, %c0_i32_0 : i32, i32
  }
  func.func @transform_4(%arg0: i32) -> (i32, i32) {
    %c0_i32 = arith.constant 0 : i32
    %c0_i32_0 = arith.constant 0 : i32
    %c0_i32_1 = arith.constant 0 : i32
    return %c0_i32, %c0_i32_0 : i32, i32
  }
  func.func @transform_5(%arg0: i32) -> (i32, i32, i32) {
    %c0_i32 = arith.constant 0 : i32
    %c0_i32_0 = arith.constant 0 : i32
    %c0_i32_1 = arith.constant 0 : i32
    return %arg0, %c0_i32, %c0_i32_0 : i32, i32, i32
  }
}

</mosaic_0001>

<bundles_post_ra>
// kernel: tpu_custom_call.1
= control target key start
LH: loop header
LB: loop body
LE: loop exit
PB: predicated region body
PF: predicated region fallthrough
CT: control target
= control target key end

     0   :  { %10 = vsyncpa [#allocation3], 0  ;;  %s971_s0 = inlined_call_operand.hbm [shape: f32[2,4,256], index: 0, kind: input, shape index: {}]   ;;  %s972_s1 = inlined_call_operand.vmem [shape: f32[4,2], index: 1, kind: input, shape index: {}]   ;;  %s973_s2 = inlined_call_operand.vmem [shape: f32[1,2], index: 2, kind: input, shape index: {}]   ;;  %s974_s3 = inlined_call_operand.vmem [shape: f32[2,4], index: 3, kind: input, shape index: {}]   ;;  %s975_s4 = inlined_call_operand.vmem [shape: f32[1,4], index: 4, kind: input, shape index: {}]   ;;  %s976_s5 = inlined_call_operand.hbm [shape: f32[2,4,256], index: 5, kind: output, shape index: {}]  }
   0x1   :  { %12 = vsyncpa [#allocation3 + $0x1], 0 }
   0x2   :  { %13 = vsyncpa [#allocation4], 0 }
   0x3   :  { %15 = vsyncpa [#allocation4 + $0x1], 0  ;;  %s782_s18 = smov 0   ;;  %s784_s19 = smov 0  }
   0x4   :  { %s786_s20 = smov 0   ;;  %s788_s21 = smov 0  }
   0x5 LB: > { %s803_s22 = sadd.s32 4294967295, %s745_s21   ;;  %s558_s23 = sadd.s32 4294967294, %s745_s21   ;;  %s745_s21 = sphi %s788_s21, %s991_s21   ;;  %s741_s20 = sphi %s786_s20, %s990_s20   ;;  %s737_s19 = sphi %s784_s19, %s989_s19   ;;  %s733_s18 = sphi %s782_s18, %s988_s18  }
   0x6   : > { %s807_s24 = sadd.s32 1, %s745_s21   ;;  %s28_s25 = sadd.s32 1, %s741_s20 }
   0x7   : > { %s25_s26 = ssub.s32 %s745_s21, %s807_s24  ;;  %p35_p0 = scmp.ne.s32.totalorder %s741_s20, %s737_s19 }
   0x8   : > { %p26_p1 = scmp.eq.s32.totalorder %s25_s26, 0  ;;  %p36_p2 = scmp.eq.s32.totalorder %s745_s21, 0 }
   0x9   : > { %p41_p3 = scmp.ne.s32.totalorder %s737_s19, %s733_s18  ;;  %p42_p4 = scmp.eq.s32.totalorder %s803_s22, 0 }
   0xa   : > { %s819_s27 = scalar_select %p26_p1, %s741_s20, %s28_s25  }
   0xb   : > { %p821_p5 = por %p36_p2, %p35_p0  ;;  %p825_p6 = por %p42_p4, %p41_p3 }
   0xc   : > { %p149_p7 = scmp.eq.s32.totalorder %s803_s22, 1  ;;  %p155_p8 = scmp.eq.s32.totalorder %s558_s23, 1 }
   0xd   : > { %p607_p10 = scmp.lt.s32.totalorder %s745_s21, 2  ;;  %s187_s7 = sand.u32 1, %s741_s20  }
   0xe   : > { %p832_p11 = por %p149_p7, %p35_p0  ;;  %p836_p12 = por %p155_p8, %p41_p3 }
   0xf   : > { %s579_s8 = sshll.u32 %s745_s21, 7  ;;  %s561_s9 = sshll.u32 %s187_s7, 3 }
  0x10   : > { %s980_s30 = scalar_select %p832_p11, 1, 0 }
  0x11   : > { %s981_s6 = scalar_select %p836_p12, 1, 0 }
  0x12   : > { %s845_s12 = scalar_lea.hbm %s971_s0, %s579_s8  ;;  %s191_s13 = scalar_lea.vmem [#allocation2], %s561_s9 }
  0x13   : > { %s199_s14 = sshll.u32 %s191_s13, 4  ;;  %p849_p13 = pnand %p607_p10, %p821_p5  ;;  %s853_s14 = int_to_ptr.vmem [resolvable:$true] %s199_s14 }
  0x14   : > { %s188_s16 = scalar_lea.sflag [#allocation3], %s187_s7  ;;  %s649_s17 = scalar_lea.hbm %s845_s12, 128 }
  0x15   : > { %p650_p2 = scmp.ne.s32.totalorder %s845_s12, %s649_s17  ;;  %p651_p3 = pneg %p849_p13 }
  0x16   : > { %s654_s26 = scalar_lea.hbm %s971_s0, 256  ;;  %p655_p5 = scmp.lt.u32.totalorder %s845_s12, %s971_s0 }
  0x17   : > { %p652_p4 = pnand %p651_p3, %p650_p2  ;;  %p656_p8 = scmp.lt.u32.totalorder %s654_s26, %s649_s17 }
  0x18   : > { %p658_p9 = scmp.lt.u32.totalorder %s649_s17, %s845_s12 }
  0x19   : > { %p653_p7 = pneg %p652_p4  ;;  %p657_p10 = por %p656_p8, %p655_p5 }
  0x1b   : > { %p659_p0 = por %p658_p9, %p657_p10 }
  0x1d   : > { %p660_p1 = pnand %p659_p0, %p653_p7 }
  0x1f   : > { %663 = shalt.err (!%p660_p1)
}
  0x20   : > { %s664_s7 = scalar_lea.vmem %s853_s14, 128  ;;  %s747_s9 = smov [#allocation2]  }
  0x21   : > { %p665_p2 = scmp.ne.s32.totalorder %s853_s14, %s664_s7  ;;  %s669_s10 = sshll.u32 %s747_s9, 4  ;;  %s670_s10 = int_to_ptr.vmem [resolvable:$false] %s669_s10 }
  0x22   : > { %s671_s11 = scalar_lea.vmem %s670_s10, 256  ;;  %p672_p11 = scmp.lt.s32.totalorder %s853_s14, %s670_s10 }
  0x23   : > { %p667_p4 = pnand %p665_p2, %p651_p3  ;;  %p673_p5 = scmp.lt.s32.totalorder %s671_s11, %s664_s7 }
  0x25   : > { %p668_p12 = pneg %p667_p4  ;;  %p674_p8 = por %p673_p5, %p672_p11 }
  0x27   : > { %p675_p9 = pnand %p674_p8, %p668_p12 }
  0x29   : > { %678 = shalt.err (!%p675_p9)
}
  0x2a   : > { %602 = dma.hbm_to_vmem [thread:$0]  (!%p849_p13), %s845_s12, 128, %s853_s14, %s188_s16  }
  0x2b   : > { %p983_p0 = scmp.lt.s32.totalorder %s745_s21, 3  ;;  %p984_p1 = scmp.ge.s32.totalorder %s745_s21, 1 }
  0x2d   : > { %p205_p3 = pnand %p984_p1, %p983_p0 }
  0x2e   : > { %s887_s13 = sand.u32 (!%p205_p3), 1, %s737_s19  }
  0x2f   : > { %208 = sbr.rel (%p205_p3) target bundleno = 805 (0x325), region = 40  ;;  %s565_s17 = sshll.u32 (!%p205_p3), %s887_s13, 3 }
  0x30   : > { %s211_s23 = scalar_lea.sflag (!%p205_p3), [#allocation3], %s887_s13  ;;  %s214_s15 = scalar_lea.vmem (!%p205_p3), [#allocation2], %s565_s17 }
  0x36   : > { %724 = dma.done.wait (%p825_p6), %s211_s23, 128  }
  0x37   : > { %726 = vsyncadd (%p825_p6), %s211_s23, 4294967168  ;;  %vm245_vm0 = vcmask 1043456   ;;  %v897_v0 = vld [vmem:[%s214_s15] sm:$0xff]  ;;  %v748_v9 = vmov 0.0   ;;  %vm749_vm1 = vmmov 0   ;;  %v258_v10 = vlaneseq  ;;  %s580_s7 = sshll.u32 %s803_s22, 7 }
  0x38   : > { %v243_v1 = vcombine.high %v897_v0, %v897_v0  ;;  %v251_v2 = vsel %vm245_vm0, %v897_v0, 0.0  ;;  %v246_v4 = vsel %vm245_vm0, %v897_v0, -inf  ;;  %v273_v8 = vld [vmem:[%s972_s1] sm:$0xf]  ;;  %585 = vmatprep.subr.mxu0 %v748_v9  ;;  %587 = vmatprep.mubr.msk.f32.mxu0 %vm749_vm1, %v748_v9  ;;  %vm271_vm2 = vcmask 1040384   ;;  %s240_s9 = scalar_lea.vmem [#allocation5], %s565_s17  ;;  %s927_s15 = scalar_lea.hbm %s976_s5, %s580_s7 }
  0x39   : > { %586 = vmatpush3.msk.msra.mxu0 %vm245_vm0, %v273_v8  ;;  %590 = vmatprep.subr.mxu1 %v748_v9  ;;  %v259_v11 = vand.u32 127, %v258_v10  ;;  %v261_v12 = vshrl.u32 %v258_v10, 7  ;;  %vm283_vm3 = vcmask 31744   ;;  %v275_v20 = vld [vmem:[%s974_s3] sm:$0x3]  ;;  %vm371_vm4 = vcmask 1041408  }
  0x3a   : > { %v252_v3 = vsel %vm245_vm0, %v243_v1, 0.0  ;;  %v247_v5 = vsel %vm245_vm0, %v243_v1, -inf  ;;  %592 = vmatprep.mubr.msk.f32.mxu1 %vm749_vm1, %v748_v9  ;;  %591 = vmatpush3.msk.msra.mxu1 %vm371_vm4, %v275_v20  ;;  %v567_v21 = vld [vmem:[%s973_s2] ss:$0 sm:$0xff]  ;;  %vm367_vm5 = vcmask 15360   ;;  %s488_s10 = sshll.u32 %s240_s9, 4  ;;  %s929_s10 = int_to_ptr.vmem [resolvable:$true] %s488_s10 }
  0x3b   : > { %v253_v6 = vadd.f32 %v252_v3, %v251_v2  ;;  %v248_v7 = vmax.f32 %v246_v4, %v247_v5  ;;  %v262_v14 = vsub.s32 %v259_v11, %v261_v12  ;;  %v570_v26 = vld [vmem:[%s975_s4] ss:$0 sm:$0xff]  ;;  %v457_v35 = vsub.s32 0, %v261_v12  ;;  %s474_s29 = scalar_lea.sflag [#allocation4], %s887_s13  ;;  %s679_s12 = scalar_lea.vmem %s929_s10, 128 }
  0x3c   : > { %v750_v38 = vmov 839922192   ;;  %p680_p6 = scmp.ne.s32.totalorder %s929_s10, %s679_s12  ;;  %p985_p11 = scmp.ne.s32.totalorder %s980_s30, 0 }
  0x3d   : > { %254 = vadd.xlane.f32.xlu0 %v253_v6  ;;  %v464_v39 = vunpack.c.l.s4 %v750_v38  ;;  %s751_s22 = smov [#allocation5]  }
  0x3e   : > { %p681_p12 = pnand %p680_p6, %p985_p11  ;;  %s683_s17 = sshll.u32 %s751_s22, 4  ;;  %s684_s17 = int_to_ptr.vmem [resolvable:$false] %s683_s17 }
  0x3f   : > { %v465_v40 = vunpack.c.0.s8 %v464_v39  ;;  %s685_s14 = scalar_lea.vmem %s684_s17, 256  ;;  %p686_p7 = scmp.lt.s32.totalorder %s929_s10, %s684_s17 }
  0x40   : > { %p682_p13 = pneg %p681_p12  ;;  %p687_p10 = scmp.lt.s32.totalorder %s685_s14, %s679_s12 }
  0x41   : > { %249 = vmax.xlane.f32.xlu0 %v248_v7  ;;  %v468_v41 = vsub.s32 %v465_v40, %v261_v12 }
  0x42   : > { %p688_p2 = por %p687_p10, %p686_p7 }
  0x44   : > { %p689_p4 = pnand %p688_p2, %p682_p13 }
  0xca   : > { %v255_v13 = vpop.xlane.xlu0 %254 }
  0xcb   : > { %v256_v15 = vmul.f32 0.00390625, %v255_v13 }
  0xcd   : > { %v269_v17 = vrot.slane %v256_v15, %v262_v14 }
  0xce   : > { %v250_v16 = vpop.xlane.xlu0 %249 }
  0xcf   : > { %v263_v18 = vrot.slane %v250_v16, %v262_v14 }
  0xd1   : > { %v272_v19 = vsel %vm271_vm2, %v263_v18, %v269_v17 }
  0xd2   : > { %588 = vmatmul.mubr.msk.f32.vlgmr.msra.gmra.mrb[0].mxu0 %vm283_vm3, %v272_v19 }
 0x1a5   : > { %v356_v22 = vpop.f32.mrb[0].mxu0 }
 0x1a6   : > { %v357_v23 = vadd.f32 %v567_v21, %v356_v22  ;;  %v589_v24 = vpop.f32.mrb[1].mxu0 }
 0x1a8   : > { %v360_v25 = vmax.f32 %v357_v23, 0.0 }
 0x1aa   : > { %593 = vmatmul.mubr.msk.f32.vlgmr.msra.gmra.mrb[0].mxu1 %vm367_vm5, %v360_v25 }
 0x27d   : > { %v441_v27 = vpop.f32.mrb[0].mxu1 }
 0x27e   : > { %v442_v28 = vadd.f32 %v570_v26, %v441_v27  ;;  %v594_v29 = vpop.f32.mrb[1].mxu1 }
 0x280   : > { %v446_v30 = vrot.slane %v442_v28, 1 }
 0x282   : > { %v448_v31 = vadd.f32 %v446_v30, %v442_v28 }
 0x284   : > { %v573_v32 = vmul.f32 -1.442695, %v448_v31 }
 0x286   : > { %645 = vpow2.f32 %v573_v32 }
 0x290   : > { %v646_v33 = vpop.eup %645 }
 0x291   : > { %v452_v34 = vadd.f32 1.0, %v646_v33 }
 0x293   : > { %647 = vrcp.f32 %v452_v34 }
 0x29d   : > { %v648_v36 = vpop.eup %647 }
 0x29e   : > { %v458_v37 = vrot.slane %v648_v36, %v457_v35 }
 0x2a0   : > { %460 = vbcast.lane.b32.xlu1 %v458_v37, 256 }
 0x312   : > { %v461_v42 = vpop.permute.xlu1 %460 }
 0x313   : > { %v469_v43 = vrot.slane %v461_v42, %v468_v41 }
 0x315   : > { %v471_v44 = vmul.f32 %v469_v43, %v897_v0 }
 0x317   : > { %472 = vst [vmem:[%s240_s9] sm:$0xff] %v471_v44 }
 0x318   : > { %692 = shalt.err (!%p689_p4)
}
 0x319   : > { %s693_s13 = scalar_lea.hbm %s927_s15, 128  ;;  %s697_s26 = scalar_lea.hbm %s976_s5, 256 }
 0x31a   : > { %p694_p5 = scmp.ne.s32.totalorder %s927_s15, %s693_s13  ;;  %p698_p0 = scmp.lt.u32.totalorder %s927_s15, %s976_s5 }
 0x31b   : > { %p699_p1 = scmp.lt.u32.totalorder %s697_s26, %s693_s13  ;;  %p701_p6 = scmp.lt.u32.totalorder %s693_s13, %s927_s15 }
 0x31c   : > { %p695_p8 = pnand %p694_p5, %p985_p11 }
 0x31d   : > { %p700_p3 = por %p699_p1, %p698_p0 }
 0x31e   : > { %p696_p9 = pneg %p695_p8 }
 0x31f   : > { %p702_p12 = por %p701_p6, %p700_p3 }
 0x321   : > { %p703_p13 = pnand %p702_p12, %p696_p9 }
 0x323   : > { %706 = shalt.err (!%p703_p13)
}
 0x324   : > { %597 = dma.vmem_to_hbm [thread:$0]  (%p985_p11), %s929_s10, 128, %s927_s15, %s474_s29  }
 0x325 PF: > { %s500_s7 = sand.u32 1, %s733_s18   ;;  %p986_p7 = scmp.ne.s32.totalorder %s981_s6, 0 }
 0x326   : > { %p987_p10 = scmp.ge.s32.totalorder %s745_s21, 2  ;;  %s501_s9 = scalar_lea.sflag [#allocation4], %s500_s7 }
 0x328   : > { %p604_p2 = pnand %p987_p10, %p986_p7 }
 0x32a   : > { %728 = dma.done.wait (!%p604_p2), %s501_s9, 128  }
 0x32b   : > { %730 = vsyncadd (!%p604_p2), %s501_s9, 4294967168  ;;  %p18_p4 = scmp.ge.s32.totalorder %s807_s24, 4   ;;  %s988_s18 = smov %s737_s19 }
 0x32c   : > { %s989_s19 = smov %s741_s20  ;;  %s990_s20 = smov %s819_s27 }
 0x32d   : > { %s991_s21 = smov %s807_s24  ;;  %20 = sbr.rel (!%p18_p4) target bundleno = 5 (0x5), region = 85 }
 0x334   :  { %506 = vsyncpa [#allocation3], 1 }
 0x335   :  { %508 = vsyncpa [#allocation3 + $0x1], 1 }
 0x336   :  { %509 = vsyncpa [#allocation4], 1 }
 0x337   :  { %511 = vsyncpa [#allocation4 + $0x1], 1 }

</bundles_post_ra>
